<compile_context>
chip_gen: v5e
topology: v5e:2x2
jax: 0.10.0
libtpu: 0.0.40
codegen_flags: <defaults>
</compile_context>

<pallas_src>
import jax
import jax.numpy as jnp
from jax.experimental import pallas as pl
from jax.experimental.pallas import tpu as pltpu

IN_DIM = 28 * 28   # 784
H1 = 128
H2 = 64
OUT_DIM = 10
OUT_PAD = 128      # padded layer-3 width for MXU compute only (never hits HBM)


def mlp_kernel(x_ref, w1_ref, b1_ref, w2_ref, b2_ref, w3_ref, b3_ref, o_ref):
    # x arrives as f32; cast to bf16 on the VPU (hidden under the tile DMA).
    x = x_ref[...].astype(jnp.bfloat16)
    # Layer 1: (TB,784)bf16 @ (784,128)bf16 -> f32 acc, +bias (f32), ReLU
    h1 = jnp.dot(x, w1_ref[...], preferred_element_type=jnp.float32)
    h1 = jnp.maximum(h1 + b1_ref[...], 0.0).astype(jnp.bfloat16)
    # Layer 2: (TB,128) @ (128,64) -> f32 acc, +bias, ReLU
    h2 = jnp.dot(h1, w2_ref[...], preferred_element_type=jnp.float32)
    h2 = jnp.maximum(h2 + b2_ref[...], 0.0).astype(jnp.bfloat16)
    # Layer 3: (TB,64) @ (64,128 padded) -> f32 logits; store only the 10 real ones.
    logits = jnp.dot(h2, w3_ref[...], preferred_element_type=jnp.float32) + b3_ref[...]
    o_ref[...] = logits[:, :OUT_DIM]


def _round_up(x, m):
    return (x + m - 1) // m * m


def prepare_params(params):
    """One-time parameter prep (hoisted out of the per-step hot path)."""
    w1, b1, w2, b2, w3, b3 = params
    w1b = w1.astype(jnp.bfloat16)                      # (784, 128)
    w2b = w2.astype(jnp.bfloat16)                      # (128, 64)
    # Zero-pad layer-3 params to 128 output lanes for full-width MXU compute.
    w3b = jnp.zeros((H2, OUT_PAD), jnp.bfloat16).at[:, :OUT_DIM].set(
        w3.astype(jnp.bfloat16))
    b1r = jnp.asarray(b1, jnp.float32).reshape(1, H1)
    b2r = jnp.asarray(b2, jnp.float32).reshape(1, H2)
    b3p = jnp.zeros((1, OUT_PAD), jnp.float32).at[:, :OUT_DIM].set(
        jnp.asarray(b3, jnp.float32).reshape(1, OUT_DIM))
    return (w1b, b1r, w2b, b2r, w3b, b3p)


def mlp_forward(x_nchw, prepped_params, *, tile_b=2048):
    """x_nchw: (B, 1, 28, 28) float32 (NCHW, like PyTorch). Returns (B, 10) f32 logits."""
    w1b, b1r, w2b, b2r, w3b, b3p = prepped_params
    B = x_nchw.shape[0]

    # nn.Flatten (C=1, row-major => identical layout). Stays f32 -> no cast pass.
    x = x_nchw.reshape(B, -1)

    # Batch tile: multiple of 8 (f32 sublanes), capped at tile_b, and clamped to
    # ~ceil(B/2) so large batches always give >= 2 grid steps (both TCs on v7x).
    tb = min(tile_b, _round_up(pl.cdiv(B, 2), 8))
    grid = (pl.cdiv(B, tb),)   # last block may be partial; no jnp.pad copy of x.

    resident = lambda shape: pl.BlockSpec(shape, lambda i: (0, 0))  # weights stay in VMEM

    param_bytes = (w1b.size + w2b.size + w3b.size) * 2 + (b1r.size + b2r.size + b3p.size) * 4
    cost = pl.CostEstimate(
        flops=2 * B * (IN_DIM * H1 + H1 * H2 + H2 * OUT_PAD),
        transcendentals=0,
        bytes_accessed=B * IN_DIM * 4 + B * OUT_DIM * 4 + param_bytes,
    )

    out = pl.pallas_call(
        mlp_kernel,
        out_shape=jax.ShapeDtypeStruct((B, OUT_DIM), jnp.float32),
        grid=grid,
        in_specs=[
            pl.BlockSpec((tb, IN_DIM), lambda i: (i, 0)),  # x streams per batch tile
            resident((IN_DIM, H1)),
            resident((1, H1)),
            resident((H1, H2)),
            resident((1, H2)),
            resident((H2, OUT_PAD)),
            resident((1, OUT_PAD)),
        ],
        out_specs=pl.BlockSpec((tb, OUT_DIM), lambda i: (i, 0)),
        compiler_params=pltpu.CompilerParams(
            dimension_semantics=("parallel",),   # shard batch tiles across TCs on v7x
            vmem_limit_bytes=48 * 1024 * 1024,   # room for tb=2048..4096 double-buffered f32 x
        ),
        cost_estimate=cost,
    )(x, w1b, b1r, w2b, b2r, w3b, b3p)

    return out


def init_params(key):
    """Deterministic PyTorch-style init: U(-1/sqrt(fan_in), 1/sqrt(fan_in))."""
    dims = [(IN_DIM, H1), (H1, H2), (H2, OUT_DIM)]
    params = []
    for (fan_in, fan_out) in dims:
        key, kw, kb = jax.random.split(key, 3)
        bound = 1.0 / (fan_in ** 0.5)
        w = jax.random.uniform(kw, (fan_in, fan_out), jnp.float32, -bound, bound)
        b = jax.random.uniform(kb, (1, fan_out), jnp.float32, -bound, bound)
        params += [w, b]
    return tuple(params)


def _reference(x_nchw, params):
    xf = x_nchw.reshape(x_nchw.shape[0], -1)
    w1, b1, w2, b2, w3, b3 = params
    h = jnp.maximum(xf @ w1 + b1, 0.0)
    h = jnp.maximum(h @ w2 + b2, 0.0)
    return h @ w3 + b3


if __name__ == "__main__":
    key = jax.random.PRNGKey(0)
    kx, kx2, kp = jax.random.split(key, 3)
    params = init_params(kp)
    prepped = prepare_params(params)   # one-time prep, outside the hot path

    # Small MNIST-like batch, NCHW as PyTorch expects.
    x = jax.random.normal(kx, (8, 1, 28, 28), jnp.float32)
    out = jax.block_until_ready(mlp_forward(x, prepped))
    ref = _reference(x, params)
    assert out.shape == (8, 10)
    assert jnp.allclose(out, ref, atol=5e-2, rtol=5e-2), (
        f"max abs err {float(jnp.max(jnp.abs(out - ref)))}")

    # Also exercise the multi-step grid with a partial last block (no jnp.pad path).
    x2 = jax.random.normal(kx2, (20, 1, 28, 28), jnp.float32)
    out2 = jax.block_until_ready(mlp_forward(x2, prepped, tile_b=16))
    ref2 = _reference(x2, params)
    assert out2.shape == (20, 10)
    assert jnp.allclose(out2, ref2, atol=5e-2, rtol=5e-2), (
        f"max abs err {float(jnp.max(jnp.abs(out2 - ref2)))}")

    print("KERNEL_OK")
</pallas_src>

<mosaic_0001>
module attributes {stable_mosaic.version = 11 : i64} {
  func.func @mlp_kernel(%arg0: i32, %arg1: memref<8x784xf32, #tpu.memory_space<vmem>>, %arg2: memref<784x128xbf16, #tpu.memory_space<vmem>>, %arg3: memref<1x128xf32, #tpu.memory_space<vmem>>, %arg4: memref<128x64xbf16, #tpu.memory_space<vmem>>, %arg5: memref<1x64xf32, #tpu.memory_space<vmem>>, %arg6: memref<64x128xbf16, #tpu.memory_space<vmem>>, %arg7: memref<1x128xf32, #tpu.memory_space<vmem>>, %arg8: memref<8x10xf32, #tpu.memory_space<vmem>>) attributes {dimension_semantics = [#tpu.dimension_semantics<parallel>], iteration_bounds = array<i64: 1>, scalar_prefetch = 0 : i64, scratch_operands = 0 : i64, tpu.core_type = #tpu.core_type<tc>, window_params = [{transform_indices = @transform_0, window_bounds = array<i64: 8, 784>}, {pipeline_mode = #tpu.pipeline_mode<synchronous>, transform_indices = @transform_1, window_bounds = array<i64: 784, 128>}, {pipeline_mode = #tpu.pipeline_mode<synchronous>, transform_indices = @transform_2, window_bounds = array<i64: 1, 128>}, {pipeline_mode = #tpu.pipeline_mode<synchronous>, transform_indices = @transform_3, window_bounds = array<i64: 128, 64>}, {pipeline_mode = #tpu.pipeline_mode<synchronous>, transform_indices = @transform_4, window_bounds = array<i64: 1, 64>}, {pipeline_mode = #tpu.pipeline_mode<synchronous>, transform_indices = @transform_5, window_bounds = array<i64: 64, 128>}, {pipeline_mode = #tpu.pipeline_mode<synchronous>, transform_indices = @transform_6, window_bounds = array<i64: 1, 128>}, {transform_indices = @transform_7, window_bounds = array<i64: 8, 10>}]} {
    %c0 = arith.constant 0 : index
    %c0_0 = arith.constant 0 : index
    %0 = vector.load %arg1[%c0, %c0_0] : memref<8x784xf32, #tpu.memory_space<vmem>>, vector<8x784xf32>
    %1 = arith.truncf %0 : vector<8x784xf32> to vector<8x784xbf16>
    %c0_1 = arith.constant 0 : index
    %c0_2 = arith.constant 0 : index
    %2 = vector.load %arg2[%c0_1, %c0_2] : memref<784x128xbf16, #tpu.memory_space<vmem>>, vector<784x128xbf16>
    %cst = arith.constant dense<0.000000e+00> : vector<8x128xf32>
    %3 = tpu.matmul %1, %2, %cst {dimension_numbers = #tpu.dot_dimension_numbers<[1], [0], [0], [1], [0, 0, 1, 1], [], []>} : vector<8x784xbf16>, vector<784x128xbf16>, vector<8x128xf32> -> vector<8x128xf32>
    %c0_3 = arith.constant 0 : index
    %c0_4 = arith.constant 0 : index
    %4 = vector.load %arg3[%c0_3, %c0_4] : memref<1x128xf32, #tpu.memory_space<vmem>>, vector<1x128xf32>
    %5 = vector.broadcast %4 : vector<1x128xf32> to vector<8x128xf32>
    %6 = arith.addf %3, %5 : vector<8x128xf32>
    %cst_5 = arith.constant 0.000000e+00 : f32
    %7 = vector.broadcast %cst_5 : f32 to vector<8x128xf32>
    %8 = arith.maximumf %6, %7 : vector<8x128xf32>
    %9 = arith.truncf %8 : vector<8x128xf32> to vector<8x128xbf16>
    %c0_6 = arith.constant 0 : index
    %c0_7 = arith.constant 0 : index
    %10 = vector.load %arg4[%c0_6, %c0_7] : memref<128x64xbf16, #tpu.memory_space<vmem>>, vector<128x64xbf16>
    %cst_8 = arith.constant dense<0.000000e+00> : vector<8x64xf32>
    %11 = tpu.matmul %9, %10, %cst_8 {dimension_numbers = #tpu.dot_dimension_numbers<[1], [0], [0], [1], [0, 0, 1, 1], [], []>} : vector<8x128xbf16>, vector<128x64xbf16>, vector<8x64xf32> -> vector<8x64xf32>
    %c0_9 = arith.constant 0 : index
    %c0_10 = arith.constant 0 : index
    %12 = vector.load %arg5[%c0_9, %c0_10] : memref<1x64xf32, #tpu.memory_space<vmem>>, vector<1x64xf32>
    %13 = vector.broadcast %12 : vector<1x64xf32> to vector<8x64xf32>
    %14 = arith.addf %11, %13 : vector<8x64xf32>
    %cst_11 = arith.constant 0.000000e+00 : f32
    %15 = vector.broadcast %cst_11 : f32 to vector<8x64xf32>
    %16 = arith.maximumf %14, %15 : vector<8x64xf32>
    %17 = arith.truncf %16 : vector<8x64xf32> to vector<8x64xbf16>
    %c0_12 = arith.constant 0 : index
    %c0_13 = arith.constant 0 : index
    %18 = vector.load %arg6[%c0_12, %c0_13] : memref<64x128xbf16, #tpu.memory_space<vmem>>, vector<64x128xbf16>
    %cst_14 = arith.constant dense<0.000000e+00> : vector<8x128xf32>
    %19 = tpu.matmul %17, %18, %cst_14 {dimension_numbers = #tpu.dot_dimension_numbers<[1], [0], [0], [1], [0, 0, 1, 1], [], []>} : vector<8x64xbf16>, vector<64x128xbf16>, vector<8x128xf32> -> vector<8x128xf32>
    %c0_15 = arith.constant 0 : index
    %c0_16 = arith.constant 0 : index
    %20 = vector.load %arg7[%c0_15, %c0_16] : memref<1x128xf32, #tpu.memory_space<vmem>>, vector<1x128xf32>
    %21 = vector.broadcast %20 : vector<1x128xf32> to vector<8x128xf32>
    %22 = arith.addf %19, %21 : vector<8x128xf32>
    %23 = vector.extract_strided_slice %22 {offsets = [0, 0], sizes = [8, 10], strides = [1, 1]} : vector<8x128xf32> to vector<8x10xf32>
    %c0_17 = arith.constant 0 : index
    %c0_18 = arith.constant 0 : index
    %24 = vector.load %arg8[%c0_17, %c0_18] : memref<8x10xf32, #tpu.memory_space<vmem>>, vector<8x10xf32>
    tpu.vector_store %arg8[%c0_17, %c0_18], %23 {strides = array<i32>} : memref<8x10xf32, #tpu.memory_space<vmem>>, vector<8x10xf32>,
    return
  }
  func.func @transform_0(%arg0: i32) -> (i32, i32) {
    %c0_i32 = arith.constant 0 : i32
    %c0_i32_0 = arith.constant 0 : i32
    return %arg0, %c0_i32 : i32, i32
  }
  func.func @transform_1(%arg0: i32) -> (i32, i32) {
    %c0_i32 = arith.constant 0 : i32
    %c0_i32_0 = arith.constant 0 : i32
    %c0_i32_1 = arith.constant 0 : i32
    return %c0_i32, %c0_i32_0 : i32, i32
  }
  func.func @transform_2(%arg0: i32) -> (i32, i32) {
    %c0_i32 = arith.constant 0 : i32
    %c0_i32_0 = arith.constant 0 : i32
    %c0_i32_1 = arith.constant 0 : i32
    return %c0_i32, %c0_i32_0 : i32, i32
  }
  func.func @transform_3(%arg0: i32) -> (i32, i32) {
    %c0_i32 = arith.constant 0 : i32
    %c0_i32_0 = arith.constant 0 : i32
    %c0_i32_1 = arith.constant 0 : i32
    return %c0_i32, %c0_i32_0 : i32, i32
  }
  func.func @transform_4(%arg0: i32) -> (i32, i32) {
    %c0_i32 = arith.constant 0 : i32
    %c0_i32_0 = arith.constant 0 : i32
    %c0_i32_1 = arith.constant 0 : i32
    return %c0_i32, %c0_i32_0 : i32, i32
  }
  func.func @transform_5(%arg0: i32) -> (i32, i32) {
    %c0_i32 = arith.constant 0 : i32
    %c0_i32_0 = arith.constant 0 : i32
    %c0_i32_1 = arith.constant 0 : i32
    return %c0_i32, %c0_i32_0 : i32, i32
  }
  func.func @transform_6(%arg0: i32) -> (i32, i32) {
    %c0_i32 = arith.constant 0 : i32
    %c0_i32_0 = arith.constant 0 : i32
    %c0_i32_1 = arith.constant 0 : i32
    return %c0_i32, %c0_i32_0 : i32, i32
  }
  func.func @transform_7(%arg0: i32) -> (i32, i32) {
    %c0_i32 = arith.constant 0 : i32
    %c0_i32_0 = arith.constant 0 : i32
    return %arg0, %c0_i32 : i32, i32
  }
}

</mosaic_0001>

<bundles_post_ra>
// kernel: tpu_custom_call.1
= control target key start
LH: loop header
LB: loop body
LE: loop exit
PB: predicated region body
PF: predicated region fallthrough
CT: control target
= control target key end

     0   :  { %12 = vsyncpa [#allocation3], 0  ;;  %s1188_s0 = inlined_call_operand.vmem [shape: f32[8,784], index: 0, kind: input, shape index: {}]   ;;  %s1189_s1 = inlined_call_operand.hbm [shape: bf16[784,128], index: 1, kind: input, shape index: {}]   ;;  %s1190_s2 = inlined_call_operand.vmem [shape: f32[1,128], index: 2, kind: input, shape index: {}]   ;;  %s1191_s3 = inlined_call_operand.vmem [shape: bf16[128,64], index: 3, kind: input, shape index: {}]   ;;  %s1192_s4 = inlined_call_operand.vmem [shape: f32[1,64], index: 4, kind: input, shape index: {}]   ;;  %s1193_s5 = inlined_call_operand.vmem [shape: bf16[64,128], index: 5, kind: input, shape index: {}]   ;;  %s1194_s6 = inlined_call_operand.vmem [shape: f32[1,128], index: 6, kind: input, shape index: {}]   ;;  %s1195_s7 = inlined_call_operand.hbm [shape: f32[8,10], index: 7, kind: output, shape index: {}]  }
   0x1   :  { %13 = vsyncpa [#allocation4], 0  ;;  %s20_s26 = sshll.u32 %s1189_s1, 4  ;;  %s1072_s27 = smov [#allocation2]   ;;  %s21_s26 = int_to_ptr.hbm [resolvable:$true] %s20_s26 }
   0x2   :  { %s22_s28 = sshll.u32 %s1072_s27, 4  ;;  %s1073_s29 = smov 64   ;;  %s23_s28 = int_to_ptr.vmem [resolvable:$true] %s22_s28 }
   0x3   :  { %s1074_s30 = smov 4  }
   0x4   :  { %28 = dma.hbm_to_vmem [thread:$0]  %s21_s26, 6272, %s23_s28, [#allocation3], %s1073_s29, %s1073_s29, %s1074_s30  }
   0x5   :  { %1068 = dma.done.wait [#allocation3], 6272  }
   0x6   :  { %1069 = vsyncadd [#allocation3], 4294961024  ;;  %v959_v0 = vld [vmem:[#allocation2 + $0x38] sm:$0xff]  ;;  %v958_v3 = vld [vmem:[#allocation2 + $0x30] sm:$0xff]  ;;  %vm454_vm0 = vcmask 130048   ;;  %vm670_vm1 = vcmask 523264  }
   0x7   :  { %v967_v1 = vld [vmem:[#allocation2 + $0x78] sm:$0xff]  ;;  %458 = vmatpush.bf16.msra.mxu0 %v959_v0  ;;  %v966_v4 = vld [vmem:[#allocation2 + $0x70] sm:$0xff]  ;;  %v957_v8 = vld [vmem:[#allocation2 + $0x28] sm:$0xff]  ;;  %s1075_s24 = smov [#allocation5]   ;;  %vm687_vm2 = vcmask 80896  }
   0x8   :  { %v975_v2 = vld [vmem:[#allocation2 + $0xb8] sm:$0xff]  ;;  %471 = vmatpush.bf16.msra.mxu1 %v967_v1  ;;  %v974_v5 = vld [vmem:[#allocation2 + $0xb0] sm:$0xff]  ;;  %v965_v9 = vld [vmem:[#allocation2 + $0x68] sm:$0xff]  ;;  %s694_s25 = sshll.u32 %s1075_s24, 4  ;;  %s695_s25 = int_to_ptr.vmem [resolvable:$true] %s694_s25 }
   0x9   :  { %484 = vmatpush.bf16.msra.mxu2 %v975_v2  ;;  %v983_v6 = vld [vmem:[#allocation2 + $0xf8] sm:$0xff]  ;;  %v982_v7 = vld [vmem:[#allocation2 + $0xf0] sm:$0xff]  ;;  %v973_v10 = vld [vmem:[#allocation2 + $0xa8] sm:$0xff] }
   0xa   :  { %497 = vmatpush.bf16.msra.mxu3 %v983_v6  ;;  %v981_v11 = vld [vmem:[#allocation2 + $0xe8] sm:$0xff]  ;;  %v956_v12 = vld [vmem:[#allocation2 + $0x20] sm:$0xff]  ;;  %v955_v16 = vld [vmem:[#allocation2 + $0x18] sm:$0xff] }
   0xb   :  { %459 = vmatpush.bf16.msra.mxu0 %v958_v3  ;;  %v964_v13 = vld [vmem:[#allocation2 + $0x60] sm:$0xff]  ;;  %v963_v17 = vld [vmem:[#allocation2 + $0x58] sm:$0xff]  ;;  %v954_v20 = vld [vmem:[#allocation2 + $0x10] sm:$0xff] }
   0xc   :  { %472 = vmatpush.bf16.msra.mxu1 %v966_v4  ;;  %v972_v14 = vld [vmem:[#allocation2 + $0xa0] sm:$0xff]  ;;  %v971_v18 = vld [vmem:[#allocation2 + $0x98] sm:$0xff]  ;;  %v962_v21 = vld [vmem:[#allocation2 + $0x50] sm:$0xff] }
   0xd   :  { %485 = vmatpush.bf16.msra.mxu2 %v974_v5  ;;  %v980_v15 = vld [vmem:[#allocation2 + $0xe0] sm:$0xff]  ;;  %v979_v19 = vld [vmem:[#allocation2 + $0xd8] sm:$0xff]  ;;  %v970_v22 = vld [vmem:[#allocation2 + $0x90] sm:$0xff] }
   0xe   :  { %498 = vmatpush.bf16.msra.mxu3 %v982_v7  ;;  %v978_v23 = vld [vmem:[#allocation2 + $0xd0] sm:$0xff]  ;;  %v953_v24 = vld [vmem:[#allocation2 + $0x8] sm:$0xff]  ;;  %v952_v27 = vld [vmem:[#allocation2] sm:$0xff] }
   0xf   :  { %460 = vmatpush.bf16.msra.mxu0 %v957_v8  ;;  %v961_v25 = vld [vmem:[#allocation2 + $0x48] sm:$0xff]  ;;  %v960_v29 = vld [vmem:[#allocation2 + $0x40] sm:$0xff]  ;;  %v991_v32 = vld [vmem:[#allocation2 + $0x138] sm:$0xff] }
  0x10   :  { %473 = vmatpush.bf16.msra.mxu1 %v965_v9  ;;  %v969_v26 = vld [vmem:[#allocation2 + $0x88] sm:$0xff]  ;;  %v44_v30 = vld [vmem:[%s1188_s0] sm:$0xff]  ;;  %v999_v33 = vld [vmem:[#allocation2 + $0x178] sm:$0xff] }
  0x11   :  { %486 = vmatpush.bf16.msra.mxu2 %v973_v10  ;;  %v977_v28 = vld [vmem:[#allocation2 + $0xc8] sm:$0xff]  ;;  %v968_v34 = vld [vmem:[#allocation2 + $0x80] sm:$0xff]  ;;  %v46_v35 = vld [vmem:[%s1188_s0 + $0x10] sm:$0xff]  ;;  %v51_v36 = vpack.c.bf16 %v44_v30, %v44_v30 }
  0x12   :  { %499 = vmatpush.bf16.msra.mxu3 %v981_v11  ;;  %v45_v31 = vld [vmem:[%s1188_s0 + $0x8] sm:$0xff]  ;;  %v976_v38 = vld [vmem:[#allocation2 + $0xc0] sm:$0xff]  ;;  %v47_v40 = vld [vmem:[%s1188_s0 + $0x18] sm:$0xff]  ;;  %v53_v43 = vpack.c.bf16 %v46_v35, %v46_v35 }
  0x13   :  { %461 = vmatpush.bf16.msra.mxu0 %v956_v12  ;;  %v52_v37 = vpack.c.bf16 %v45_v31, %v45_v31  ;;  %v1000_v39 = vld [vmem:[#allocation2 + $0x180] sm:$0xff]  ;;  %v990_v41 = vld [vmem:[#allocation2 + $0x130] sm:$0xff]  ;;  %v54_v44 = vpack.c.bf16 %v47_v40, %v47_v40  ;;  %v989_v45 = vld [vmem:[#allocation2 + $0x128] sm:$0xff] }
  0x14   :  { %474 = vmatpush.bf16.msra.mxu1 %v964_v13  ;;  %v998_v42 = vld [vmem:[#allocation2 + $0x170] sm:$0xff]  ;;  %v997_v46 = vld [vmem:[#allocation2 + $0x168] sm:$0xff]  ;;  %v988_v47 = vld [vmem:[#allocation2 + $0x120] sm:$0xff] }
  0x15   :  { %487 = vmatpush.bf16.msra.mxu2 %v972_v14  ;;  %v996_v48 = vld [vmem:[#allocation2 + $0x160] sm:$0xff]  ;;  %v987_v49 = vld [vmem:[#allocation2 + $0x118] sm:$0xff]  ;;  %v50_v51 = vld [vmem:[%s1188_s0 + $0x30] sm:$0xff] }
  0x16   :  { %500 = vmatpush.bf16.msra.mxu3 %v980_v15  ;;  %v995_v50 = vld [vmem:[#allocation2 + $0x158] sm:$0xff]  ;;  %v986_v52 = vld [vmem:[#allocation2 + $0x110] sm:$0xff]  ;;  %v57_v54 = vpack.c.bf16 %v50_v51, %v50_v51  ;;  %v985_v55 = vld [vmem:[#allocation2 + $0x108] sm:$0xff] }
  0x17   :  { %462 = vmatpush.bf16.msra.mxu0 %v955_v16  ;;  %v994_v53 = vld [vmem:[#allocation2 + $0x150] sm:$0xff]  ;;  %v993_v56 = vld [vmem:[#allocation2 + $0x148] sm:$0xff]  ;;  %v984_v57 = vld [vmem:[#allocation2 + $0x100] sm:$0xff] }
  0x18   :  { %475 = vmatpush.bf16.msra.mxu1 %v963_v17  ;;  %v992_v58 = vld [vmem:[#allocation2 + $0x140] sm:$0xff]  ;;  %v49_v60 = vld [vmem:[%s1188_s0 + $0x28] sm:$0xff]  ;;  %v1008_v63 = vld [vmem:[%s1191_s3 + $0x38] sm:$0xff] }
  0x19   :  { %488 = vmatpush.bf16.msra.mxu2 %v971_v18  ;;  %v48_v59 = vld [vmem:[%s1188_s0 + $0x20] sm:$0xff]  ;;  %v56_v62 = vpack.c.bf16 %v49_v60, %v49_v60  ;;  %v1007_v0 = vld [vmem:[%s1191_s3 + $0x30] sm:$0xff]  ;;  %v1006_v1 = vld [vmem:[%s1191_s3 + $0x28] sm:$0xff]  ;;  %s696_s0 = sshll.u32 %s1195_s7, 4  ;;  %s697_s0 = int_to_ptr.hbm [resolvable:$true] %s696_s0 }
  0x1a   :  { %501 = vmatpush.bf16.msra.mxu3 %v979_v19  ;;  %v55_v61 = vpack.c.bf16 %v48_v59, %v48_v59  ;;  %v1005_v2 = vld [vmem:[%s1191_s3 + $0x20] sm:$0xff]  ;;  %v1004_v3 = vld [vmem:[%s1191_s3 + $0x18] sm:$0xff]  ;;  %v1003_v4 = vld [vmem:[%s1191_s3 + $0x10] sm:$0xff] }
  0x1b   :  { %463 = vmatpush.bf16.msra.mxu0 %v954_v20  ;;  %v1002_v5 = vld [vmem:[%s1191_s3 + $0x8] sm:$0xff]  ;;  %v1001_v8 = vld [vmem:[%s1191_s3] sm:$0xff]  ;;  %v1012_v11 = vld [vmem:[%s1193_s5 + $0x18] sm:$0xff] }
  0x1c   :  { %476 = vmatpush.bf16.msra.mxu1 %v962_v21  ;;  %v1011_v14 = vld [vmem:[%s1193_s5 + $0x10] sm:$0xff]  ;;  %v1017_v15 = vld [vmem:[%s1190_s2] ss:$0 sm:$0xff]  ;;  %v1010_v16 = vld [vmem:[%s1193_s5 + $0x8] sm:$0xff] }
  0x1d   :  { %489 = vmatpush.bf16.msra.mxu2 %v970_v22  ;;  %v1018_v35 = vld [vmem:[%s1192_s4] ss:$0 sm:$0xff] }
  0x1e   :  { %502 = vmatpush.bf16.msra.mxu3 %v978_v23 }
  0x1f   :  { %464 = vmatpush.bf16.msra.mxu0 %v953_v24 }
  0x20   :  { %477 = vmatpush.bf16.msra.mxu1 %v961_v25 }
  0x21   :  { %490 = vmatpush.bf16.msra.mxu2 %v969_v26 }
  0x22   :  { %503 = vmatpush.bf16.msra.mxu3 %v977_v28 }
  0x23   :  { %465 = vmatpush.bf16.msra.mxu0 %v952_v27 }
  0x24   :  { %478 = vmatpush.bf16.msra.mxu1 %v960_v29 }
  0x25   :  { %491 = vmatpush.bf16.msra.mxu2 %v968_v34  ;;  %v1009_v34 = vld [vmem:[%s1193_s5] sm:$0xff] }
  0x26   :  { %466 = vmatmul.bf16.vlgmr.msra.gmra.mxu0 %v51_v36  ;;  %504 = vmatpush.bf16.msra.mxu3 %v976_v38 }
  0x27   :  { %510 = vmatpush.bf16.msrb.mxu0 %v991_v32  ;;  %479 = vmatmul.bf16.vlgmr.msra.gmra.mxu1 %v52_v37 }
  0x28   :  { %523 = vmatpush.bf16.msrb.mxu1 %v999_v33  ;;  %492 = vmatmul.bf16.vlgmr.msra.gmra.mxu2 %v53_v43 }
  0x29   :  { %543 = vmatpush.bf16.msrb.mxu2 %v1000_v39  ;;  %505 = vmatmul.bf16.vlgmr.msra.gmra.mxu3 %v54_v44 }
  0x2a   :  { %619 = vmatpush.bf16.msrb.mxu3 %v1008_v63 }
  0x2b   :  { %511 = vmatpush.bf16.msrb.mxu0 %v990_v41  ;;  %v1019_v41 = vld [vmem:[%s1194_s6] ss:$0 sm:$0xff] }
  0x2c   :  { %524 = vmatpush.bf16.msrb.mxu1 %v998_v42 }
  0x2d   :  { %678 = vmatpush.bf16.msra.mxu2 %v1012_v11 }
  0x2e   :  { %620 = vmatpush.bf16.msrb.mxu3 %v1007_v0 }
  0x2f   :  { %512 = vmatpush.bf16.msrb.mxu0 %v989_v45 }
  0x30   :  { %525 = vmatpush.bf16.msrb.mxu1 %v997_v46 }
  0x31   :  { %679 = vmatpush.bf16.msra.mxu2 %v1011_v14 }
  0x32   :  { %621 = vmatpush.bf16.msrb.mxu3 %v1006_v1 }
  0x33   :  { %513 = vmatpush.bf16.msrb.mxu0 %v988_v47 }
  0x34   :  { %526 = vmatpush.bf16.msrb.mxu1 %v996_v48 }
  0x35   :  { %680 = vmatpush.bf16.msra.mxu2 %v1010_v16 }
  0x36   :  { %622 = vmatpush.bf16.msrb.mxu3 %v1005_v2 }
  0x37   :  { %514 = vmatpush.bf16.msrb.mxu0 %v987_v49 }
  0x38   :  { %527 = vmatpush.bf16.msrb.mxu1 %v995_v50  ;;  %902 = vmatmul.msk.bf16.vlgmr.msrb.gmra.mxu2 %vm454_vm0, %v57_v54 }
  0x39   :  { %681 = vmatpush.bf16.msra.mxu2 %v1009_v34 }
  0x3a   :  { %623 = vmatpush.bf16.msrb.mxu3 %v1004_v3 }
  0x3b   :  { %515 = vmatpush.bf16.msrb.mxu0 %v986_v52 }
  0x3c   :  { %528 = vmatpush.bf16.msrb.mxu1 %v994_v53 }
  0x3e   :  { %624 = vmatpush.bf16.msrb.mxu3 %v1003_v4 }
  0x3f   :  { %516 = vmatpush.bf16.msrb.mxu0 %v985_v55 }
  0x40   :  { %529 = vmatpush.bf16.msrb.mxu1 %v993_v56 }
  0x42   :  { %625 = vmatpush.bf16.msrb.mxu3 %v1002_v5 }
  0x43   :  { %517 = vmatpush.bf16.msrb.mxu0 %v984_v57 }
  0x44   :  { %530 = vmatpush.bf16.msrb.mxu1 %v992_v58 }
  0x46   :  { %518 = vmatmul.bf16.vlgmr.msrb.gmra.mxu0 %v55_v61  ;;  %626 = vmatpush.bf16.msrb.mxu3 %v1001_v8 }
  0x47   :  { %531 = vmatmul.bf16.vlgmr.msrb.gmra.mxu1 %v56_v62 }
  0xa3   :  { %v467_v6 = vpop.f32.mrf.mxu0 }
  0xa4   :  { %v480_v7 = vpop.f32.mrf.mxu1  ;;  %v468_v17 = vadd.f32 %v1017_v15, %v467_v6 }
  0xa6   :  { %v481_v20 = vadd.f32 %v480_v7, %v468_v17 }
  0xab   :  { %v469_v9 = vpop.f32.mrf.mxu0  ;;  %v493_v12 = vpop.f32.mrf.mxu2 }
  0xac   :  { %v482_v10 = vpop.f32.mrf.mxu1  ;;  %v506_v13 = vpop.f32.mrf.mxu3  ;;  %v494_v21 = vadd.f32 %v493_v12, %v481_v20 }
  0xae   :  { %v507_v23 = vadd.f32 %v506_v13, %v494_v21 }
  0xb3   :  { %v495_v18 = vpop.f32.mrf.mxu2 }
  0xb4   :  { %v508_v19 = vpop.f32.mrf.mxu3 }
  0xbb   :  { %v545_v22 = vpop.f32.mrf.mxu2 }
  0xc3   :  { %v519_v24 = vpop.f32.mrf.mxu0  ;;  %v547_v28 = vpop.f32.mrf.mxu2 }
  0xc4   :  { %v532_v25 = vpop.f32.mrf.mxu1  ;;  %v520_v26 = vadd.f32 %v519_v24, %v507_v23 }
  0xc6   :  { %v533_v27 = vadd.f32 %v532_v25, %v520_v26 }
  0xc8   :  { %v546_v29 = vadd.f32 %v545_v22, %v533_v27 }
  0xca   :  { %v549_v30 = vmax.f32 %v546_v29, 0.0 }
  0xcb   :  { %v521_v31 = vpop.f32.mrf.mxu0 }
  0xcc   :  { %v534_v32 = vpop.f32.mrf.mxu1  ;;  %v550_v33 = vpack.c.bf16 %v549_v30, %v549_v30 }
  0xce   :  { %627 = vmatmul.bf16.vlgmr.msrb.gmra.mxu3 %v550_v33 }
 0x151   :  { %v628_v36 = vpop.f32.mrf.mxu3 }
 0x152   :  { %v629_v37 = vadd.f32 %v1018_v35, %v628_v36 }
 0x154   :  { %v632_v38 = vmax.f32 %v629_v37, 0.0 }
 0x156   :  { %v633_v39 = vpack.c.bf16 %v632_v38, %v632_v38 }
 0x158   :  { %951 = vmatmul.msk.bf16.vlgmr.msra.gmra.mxu2 %vm670_vm1, %v633_v39 }
 0x159   :  { %v630_v40 = vpop.f32.mrf.mxu3 }
 0x1db   :  { %v683_v42 = vpop.f32.mrf.mxu2 }
 0x1dc   :  { %v684_v43 = vadd.f32 %v1019_v41, %v683_v42 }
 0x1de   :  { %688 = vst.msk [vmem:[#allocation5] sm:$0xff] %vm687_vm2, %v684_v43 }
 0x1df   :  { %699 = dma.vmem_to_hbm [thread:$0]  %s695_s25, 128, %s697_s0, [#allocation4]  }
 0x1e3   :  { %v685_v44 = vpop.f32.mrf.mxu2 }
 0x1e4   :  { %1070 = dma.done.wait [#allocation4], 128  }
 0x1e5   :  { %1071 = vsyncadd [#allocation4], 4294967168 }
 0x1e6   :  { %704 = vsyncpa [#allocation3], 1 }
 0x1e7   :  { %705 = vsyncpa [#allocation4], 1 }

</bundles_post_ra>
